<compile_context>
chip_gen: v6e
topology: v6e:2x2x1
jax: 0.10.0
libtpu: 0.0.40
codegen_flags: <defaults>
</compile_context>

<pallas_src>
import functools

import jax
import jax.numpy as jnp
from jax.experimental import pallas as pl
from jax.experimental.pallas import tpu as pltpu


# Conv layers: (in_channels, out_channels, kernel_size), activation = ReLU
LAYER_CFG = [(4, 8, 3), (8, 8, 3)]
IN_CHANNELS = LAYER_CFG[0][0]
MID_CHANNELS = LAYER_CFG[0][1]
OUT_CHANNELS = LAYER_CFG[-1][1]


# ----------------------------------------------------------------------------
# Fused Pallas kernel
# ----------------------------------------------------------------------------
def _bottleneck_kernel(x_ref, w1_ref, b1_ref, w2_ref, b2_ref, wr_ref, br_ref,
                       o_ref, pad1, pad2, *, n_img, h):
    """Fused resample(1x1) + conv1(3x3,ReLU) + conv2(3x3,ReLU) + residual add.

    Row-slab layout:
      x_ref : (N*H, W*Cin)   input rows, channels fastest on lanes
      o_ref : (N*H, W*Cout)  output rows (lane-dense, W*Cout = 128)
      w1_ref: (3, W*Cin,  W*Cmid)  banded per-vertical-tap matrices (conv1)
      w2_ref: (3, W*Cmid, W*Cout)  banded per-vertical-tap matrices (conv2)
      wr_ref: (W*Cin, W*Cout)      block-diagonal 1x1 resample matrix
      b*_ref: (1, W*C)             biases tiled along W
      pad1/pad2: VMEM scratch slabs of height N*(H+2); their zero rows realize
      the H-direction "same" padding.  W-direction padding is encoded in the
      banded matrices.
    """
    hp = h + 2

    # Zero the row-padded scratch slabs (zero rows == H padding).
    pad1[...] = jnp.zeros_like(pad1)
    pad2[...] = jnp.zeros_like(pad2)

    # Stage the input rows into the interior of pad1 (per image, static offsets).
    for img in range(n_img):
        pad1[pl.ds(img * hp + 1, h), :] = x_ref[pl.ds(img * h, h), :]

    # conv1 + bias + ReLU  ->  interior of pad2 (stays in VMEM).
    for img in range(n_img):
        acc = jnp.dot(pad1[pl.ds(img * hp + 0, h), :], w1_ref[0],
                      preferred_element_type=jnp.float32)
        acc += jnp.dot(pad1[pl.ds(img * hp + 1, h), :], w1_ref[1],
                       preferred_element_type=jnp.float32)
        acc += jnp.dot(pad1[pl.ds(img * hp + 2, h), :], w1_ref[2],
                       preferred_element_type=jnp.float32)
        pad2[pl.ds(img * hp + 1, h), :] = jnp.maximum(acc + b1_ref[...], 0.0)

    # conv2 + bias + ReLU, then add the residual (1x1 resample conv of the input).
    for img in range(n_img):
        acc = jnp.dot(pad2[pl.ds(img * hp + 0, h), :], w2_ref[0],
                      preferred_element_type=jnp.float32)
        acc += jnp.dot(pad2[pl.ds(img * hp + 1, h), :], w2_ref[1],
                       preferred_element_type=jnp.float32)
        acc += jnp.dot(pad2[pl.ds(img * hp + 2, h), :], w2_ref[2],
                       preferred_element_type=jnp.float32)
        y = jnp.maximum(acc + b2_ref[...], 0.0)
        res = jnp.dot(x_ref[pl.ds(img * h, h), :], wr_ref[...],
                      preferred_element_type=jnp.float32) + br_ref[...]
        o_ref[pl.ds(img * h, h), :] = (y + res).astype(o_ref.dtype)


# ----------------------------------------------------------------------------
# Wrapper: weight-side layout plumbing + the single pallas_call
# ----------------------------------------------------------------------------
def _band_weights(w_oihw, width):
    """(Cout,Cin,KH,KW) conv weights -> (KH, W*Cin, W*Cout) banded matrices.

    mats[di][w*Cin + c, w2*Cout + o] = w_oihw[o, c, di, w - w2 + KW//2]
    (zero outside the band), so a row-slab matmul against mats[di] applies all
    horizontal taps of vertical tap di, including the zero padding along W.
    """
    cout, cin, kh, kw = w_oihw.shape
    mats = []
    for di in range(kh):
        m = jnp.zeros((width * cin, width * cout), jnp.float32)
        for dj in range(kw):
            shift = jnp.eye(width, k=(kw // 2) - dj, dtype=jnp.float32)
            m = m + jnp.kron(shift, w_oihw[:, :, di, dj].T)
        mats.append(m)
    return jnp.stack(mats)


def _tile_bias(b, width):
    return jnp.tile(b, width).reshape(1, -1).astype(jnp.float32)


@jax.jit
def bottleneck_forward(x_nchw, params):
    n, cin, h, w = x_nchw.shape
    cmid = params["layers"][0]["w"].shape[0]
    cout = params["layers"][-1]["w"].shape[0]

    # NCHW (PyTorch) -> lane-dense row slab (N*H, W*Cin).  Pure layout plumbing.
    x_slab = jnp.transpose(x_nchw, (0, 2, 3, 1)).reshape(n * h, w * cin)

    # Weight-side transforms (tiny, operate on parameters, not activations).
    w1 = _band_weights(params["layers"][0]["w"], w)            # (3, W*Cin,  W*Cmid)
    w2 = _band_weights(params["layers"][1]["w"], w)            # (3, W*Cmid, W*Cout)
    wr = jnp.kron(jnp.eye(w, dtype=jnp.float32),
                  params["resample"]["w"][:, :, 0, 0].T)       # (W*Cin, W*Cout)
    b1 = _tile_bias(params["layers"][0]["b"], w)
    b2 = _tile_bias(params["layers"][1]["b"], w)
    br = _tile_bias(params["resample"]["b"], w)

    kernel = functools.partial(_bottleneck_kernel, n_img=n, h=h)
    out_slab = pl.pallas_call(
        kernel,
        out_shape=jax.ShapeDtypeStruct((n * h, w * cout), jnp.float32),
        scratch_shapes=[
            pltpu.VMEM((n * (h + 2), w * cin), jnp.float32),   # padded input rows
            pltpu.VMEM((n * (h + 2), w * cmid), jnp.float32),  # padded conv1 rows
        ],
    )(x_slab, w1, b1, w2, b2, wr, br)

    # Row slab -> NCHW.
    return jnp.transpose(out_slab.reshape(n, h, w, cout), (0, 3, 1, 2))


# ----------------------------------------------------------------------------
# Deterministic synthetic parameters (PyTorch-style init bounds)
# ----------------------------------------------------------------------------
def init_params(key):
    params = {"layers": []}
    for li, (cin, cout, ks) in enumerate(LAYER_CFG):
        kw_, kb_ = jax.random.split(jax.random.fold_in(key, li))
        bound = 1.0 / jnp.sqrt(cin * ks * ks)
        params["layers"].append({
            "w": jax.random.uniform(kw_, (cout, cin, ks, ks),
                                    jnp.float32, -bound, bound),
            "b": jax.random.uniform(kb_, (cout,), jnp.float32, -bound, bound),
        })
    # resample: 1x1 conv, exists because IN_CHANNELS != OUT_CHANNELS
    kw_, kb_ = jax.random.split(jax.random.fold_in(key, 1000))
    bound = 1.0 / jnp.sqrt(IN_CHANNELS)
    params["resample"] = {
        "w": jax.random.uniform(kw_, (OUT_CHANNELS, IN_CHANNELS, 1, 1),
                                jnp.float32, -bound, bound),
        "b": jax.random.uniform(kb_, (OUT_CHANNELS,), jnp.float32,
                                -bound, bound),
    }
    return params


# ----------------------------------------------------------------------------
# Pure-JAX reference for validation
# ----------------------------------------------------------------------------
def _conv_ref(x_nhwc, w_oihw, b):
    y = jax.lax.conv_general_dilated(
        x_nhwc, jnp.transpose(w_oihw, (2, 3, 1, 0)),
        window_strides=(1, 1), padding="SAME",
        dimension_numbers=("NHWC", "HWIO", "NHWC"))
    return y + b


def bottleneck_ref(x_nchw, params):
    x = jnp.transpose(x_nchw, (0, 2, 3, 1))
    res = _conv_ref(x, params["resample"]["w"], params["resample"]["b"])
    y = x
    for lp in params["layers"]:
        y = jax.nn.relu(_conv_ref(y, lp["w"], lp["b"]))
    y = y + res
    return jnp.transpose(y, (0, 3, 1, 2))


if __name__ == "__main__":
    key = jax.random.PRNGKey(0)
    k_x, k_p = jax.random.split(key)

    x = jax.random.normal(k_x, (2, IN_CHANNELS, 16, 16), jnp.float32)  # NCHW
    params = init_params(k_p)

    out = jax.block_until_ready(bottleneck_forward(x, params))

    ref = bottleneck_ref(x, params)
    assert out.shape == (2, OUT_CHANNELS, 16, 16), out.shape
    max_err = float(jnp.max(jnp.abs(out - ref)))
    assert jnp.allclose(out, ref, atol=2e-4, rtol=2e-4), max_err

    print("KERNEL_OK")
</pallas_src>

<mosaic_0001>
module attributes {stable_mosaic.version = 11 : i64} {
  func.func @_bottleneck_kernel(%arg0: memref<32x64xf32, #tpu.memory_space<vmem>>, %arg1: memref<3x64x128xf32, #tpu.memory_space<vmem>>, %arg2: memref<1x128xf32, #tpu.memory_space<vmem>>, %arg3: memref<3x128x128xf32, #tpu.memory_space<vmem>>, %arg4: memref<1x128xf32, #tpu.memory_space<vmem>>, %arg5: memref<64x128xf32, #tpu.memory_space<vmem>>, %arg6: memref<1x128xf32, #tpu.memory_space<vmem>>, %arg7: memref<32x128xf32, #tpu.memory_space<vmem>>, %arg8: memref<36x64xf32, #tpu.memory_space<vmem>>, %arg9: memref<36x128xf32, #tpu.memory_space<vmem>>) attributes {dimension_semantics = [], scalar_prefetch = 0 : i64, scratch_operands = 2 : i64, tpu.core_type = #tpu.core_type<tc>} {
    %cst = arith.constant 0.000000e+00 : f32
    %0 = vector.broadcast %cst : f32 to vector<36x64xf32>
    %c0 = arith.constant 0 : index
    %c0_0 = arith.constant 0 : index
    %1 = vector.load %arg8[%c0, %c0_0] : memref<36x64xf32, #tpu.memory_space<vmem>>, vector<36x64xf32>
    tpu.vector_store %arg8[%c0, %c0_0], %0 {strides = array<i32>} : memref<36x64xf32, #tpu.memory_space<vmem>>, vector<36x64xf32>,
    %cst_1 = arith.constant 0.000000e+00 : f32
    %2 = vector.broadcast %cst_1 : f32 to vector<36x128xf32>
    %c0_2 = arith.constant 0 : index
    %c0_3 = arith.constant 0 : index
    %3 = vector.load %arg9[%c0_2, %c0_3] : memref<36x128xf32, #tpu.memory_space<vmem>>, vector<36x128xf32>
    tpu.vector_store %arg9[%c0_2, %c0_3], %2 {strides = array<i32>} : memref<36x128xf32, #tpu.memory_space<vmem>>, vector<36x128xf32>,
    %c0_4 = arith.constant 0 : index
    %c0_5 = arith.constant 0 : index
    %4 = vector.load %arg0[%c0_4, %c0_5] : memref<32x64xf32, #tpu.memory_space<vmem>>, vector<16x64xf32>
    %c1 = arith.constant 1 : index
    %c0_6 = arith.constant 0 : index
    %5 = vector.load %arg8[%c1, %c0_6] : memref<36x64xf32, #tpu.memory_space<vmem>>, vector<16x64xf32>
    tpu.vector_store %arg8[%c1, %c0_6], %4 {strides = array<i32>} : memref<36x64xf32, #tpu.memory_space<vmem>>, vector<16x64xf32>,
    %c16 = arith.constant 16 : index
    %c0_7 = arith.constant 0 : index
    %6 = vector.load %arg0[%c16, %c0_7] : memref<32x64xf32, #tpu.memory_space<vmem>>, vector<16x64xf32>
    %c19 = arith.constant 19 : index
    %c0_8 = arith.constant 0 : index
    %7 = vector.load %arg8[%c19, %c0_8] : memref<36x64xf32, #tpu.memory_space<vmem>>, vector<16x64xf32>
    tpu.vector_store %arg8[%c19, %c0_8], %6 {strides = array<i32>} : memref<36x64xf32, #tpu.memory_space<vmem>>, vector<16x64xf32>,
    %c0_9 = arith.constant 0 : index
    %c0_10 = arith.constant 0 : index
    %8 = vector.load %arg8[%c0_9, %c0_10] : memref<36x64xf32, #tpu.memory_space<vmem>>, vector<16x64xf32>
    %c0_11 = arith.constant 0 : index
    %c0_12 = arith.constant 0 : index
    %c0_13 = arith.constant 0 : index
    %9 = vector.load %arg1[%c0_11, %c0_12, %c0_13] : memref<3x64x128xf32, #tpu.memory_space<vmem>>, vector<1x64x128xf32>
    %10 = vector.shape_cast %9 : vector<1x64x128xf32> to vector<64x128xf32>
    %cst_14 = arith.constant dense<0.000000e+00> : vector<16x128xf32>
    %11 = tpu.matmul %8, %10, %cst_14 {dimension_numbers = #tpu.dot_dimension_numbers<[1], [0], [0], [1], [0, 0, 1, 1], [], []>} : vector<16x64xf32>, vector<64x128xf32>, vector<16x128xf32> -> vector<16x128xf32>
    %c1_15 = arith.constant 1 : index
    %c0_16 = arith.constant 0 : index
    %12 = vector.load %arg8[%c1_15, %c0_16] : memref<36x64xf32, #tpu.memory_space<vmem>>, vector<16x64xf32>
    %c1_17 = arith.constant 1 : index
    %c0_18 = arith.constant 0 : index
    %c0_19 = arith.constant 0 : index
    %13 = vector.load %arg1[%c1_17, %c0_18, %c0_19] : memref<3x64x128xf32, #tpu.memory_space<vmem>>, vector<1x64x128xf32>
    %14 = vector.shape_cast %13 : vector<1x64x128xf32> to vector<64x128xf32>
    %cst_20 = arith.constant dense<0.000000e+00> : vector<16x128xf32>
    %15 = tpu.matmul %12, %14, %cst_20 {dimension_numbers = #tpu.dot_dimension_numbers<[1], [0], [0], [1], [0, 0, 1, 1], [], []>} : vector<16x64xf32>, vector<64x128xf32>, vector<16x128xf32> -> vector<16x128xf32>
    %16 = arith.addf %11, %15 : vector<16x128xf32>
    %c2 = arith.constant 2 : index
    %c0_21 = arith.constant 0 : index
    %17 = vector.load %arg8[%c2, %c0_21] : memref<36x64xf32, #tpu.memory_space<vmem>>, vector<16x64xf32>
    %c2_22 = arith.constant 2 : index
    %c0_23 = arith.constant 0 : index
    %c0_24 = arith.constant 0 : index
    %18 = vector.load %arg1[%c2_22, %c0_23, %c0_24] : memref<3x64x128xf32, #tpu.memory_space<vmem>>, vector<1x64x128xf32>
    %19 = vector.shape_cast %18 : vector<1x64x128xf32> to vector<64x128xf32>
    %cst_25 = arith.constant dense<0.000000e+00> : vector<16x128xf32>
    %20 = tpu.matmul %17, %19, %cst_25 {dimension_numbers = #tpu.dot_dimension_numbers<[1], [0], [0], [1], [0, 0, 1, 1], [], []>} : vector<16x64xf32>, vector<64x128xf32>, vector<16x128xf32> -> vector<16x128xf32>
    %21 = arith.addf %16, %20 : vector<16x128xf32>
    %c0_26 = arith.constant 0 : index
    %c0_27 = arith.constant 0 : index
    %22 = vector.load %arg2[%c0_26, %c0_27] : memref<1x128xf32, #tpu.memory_space<vmem>>, vector<1x128xf32>
    %23 = vector.broadcast %22 : vector<1x128xf32> to vector<16x128xf32>
    %24 = arith.addf %21, %23 : vector<16x128xf32>
    %cst_28 = arith.constant 0.000000e+00 : f32
    %25 = vector.broadcast %cst_28 : f32 to vector<16x128xf32>
    %26 = arith.maximumf %24, %25 : vector<16x128xf32>
    %c1_29 = arith.constant 1 : index
    %c0_30 = arith.constant 0 : index
    %27 = vector.load %arg9[%c1_29, %c0_30] : memref<36x128xf32, #tpu.memory_space<vmem>>, vector<16x128xf32>
    tpu.vector_store %arg9[%c1_29, %c0_30], %26 {strides = array<i32>} : memref<36x128xf32, #tpu.memory_space<vmem>>, vector<16x128xf32>,
    %c18 = arith.constant 18 : index
    %c0_31 = arith.constant 0 : index
    %28 = vector.load %arg8[%c18, %c0_31] : memref<36x64xf32, #tpu.memory_space<vmem>>, vector<16x64xf32>
    %c0_32 = arith.constant 0 : index
    %c0_33 = arith.constant 0 : index
    %c0_34 = arith.constant 0 : index
    %29 = vector.load %arg1[%c0_32, %c0_33, %c0_34] : memref<3x64x128xf32, #tpu.memory_space<vmem>>, vector<1x64x128xf32>
    %30 = vector.shape_cast %29 : vector<1x64x128xf32> to vector<64x128xf32>
    %cst_35 = arith.constant dense<0.000000e+00> : vector<16x128xf32>
    %31 = tpu.matmul %28, %30, %cst_35 {dimension_numbers = #tpu.dot_dimension_numbers<[1], [0], [0], [1], [0, 0, 1, 1], [], []>} : vector<16x64xf32>, vector<64x128xf32>, vector<16x128xf32> -> vector<16x128xf32>
    %c19_36 = arith.constant 19 : index
    %c0_37 = arith.constant 0 : index
    %32 = vector.load %arg8[%c19_36, %c0_37] : memref<36x64xf32, #tpu.memory_space<vmem>>, vector<16x64xf32>
    %c1_38 = arith.constant 1 : index
    %c0_39 = arith.constant 0 : index
    %c0_40 = arith.constant 0 : index
    %33 = vector.load %arg1[%c1_38, %c0_39, %c0_40] : memref<3x64x128xf32, #tpu.memory_space<vmem>>, vector<1x64x128xf32>
    %34 = vector.shape_cast %33 : vector<1x64x128xf32> to vector<64x128xf32>
    %cst_41 = arith.constant dense<0.000000e+00> : vector<16x128xf32>
    %35 = tpu.matmul %32, %34, %cst_41 {dimension_numbers = #tpu.dot_dimension_numbers<[1], [0], [0], [1], [0, 0, 1, 1], [], []>} : vector<16x64xf32>, vector<64x128xf32>, vector<16x128xf32> -> vector<16x128xf32>
    %36 = arith.addf %31, %35 : vector<16x128xf32>
    %c20 = arith.constant 20 : index
    %c0_42 = arith.constant 0 : index
    %37 = vector.load %arg8[%c20, %c0_42] : memref<36x64xf32, #tpu.memory_space<vmem>>, vector<16x64xf32>
    %c2_43 = arith.constant 2 : index
    %c0_44 = arith.constant 0 : index
    %c0_45 = arith.constant 0 : index
    %38 = vector.load %arg1[%c2_43, %c0_44, %c0_45] : memref<3x64x128xf32, #tpu.memory_space<vmem>>, vector<1x64x128xf32>
    %39 = vector.shape_cast %38 : vector<1x64x128xf32> to vector<64x128xf32>
    %cst_46 = arith.constant dense<0.000000e+00> : vector<16x128xf32>
    %40 = tpu.matmul %37, %39, %cst_46 {dimension_numbers = #tpu.dot_dimension_numbers<[1], [0], [0], [1], [0, 0, 1, 1], [], []>} : vector<16x64xf32>, vector<64x128xf32>, vector<16x128xf32> -> vector<16x128xf32>
    %41 = arith.addf %36, %40 : vector<16x128xf32>
    %c0_47 = arith.constant 0 : index
    %c0_48 = arith.constant 0 : index
    %42 = vector.load %arg2[%c0_47, %c0_48] : memref<1x128xf32, #tpu.memory_space<vmem>>, vector<1x128xf32>
    %43 = vector.broadcast %42 : vector<1x128xf32> to vector<16x128xf32>
    %44 = arith.addf %41, %43 : vector<16x128xf32>
    %cst_49 = arith.constant 0.000000e+00 : f32
    %45 = vector.broadcast %cst_49 : f32 to vector<16x128xf32>
    %46 = arith.maximumf %44, %45 : vector<16x128xf32>
    %c19_50 = arith.constant 19 : index
    %c0_51 = arith.constant 0 : index
    %47 = vector.load %arg9[%c19_50, %c0_51] : memref<36x128xf32, #tpu.memory_space<vmem>>, vector<16x128xf32>
    tpu.vector_store %arg9[%c19_50, %c0_51], %46 {strides = array<i32>} : memref<36x128xf32, #tpu.memory_space<vmem>>, vector<16x128xf32>,
    %c0_52 = arith.constant 0 : index
    %c0_53 = arith.constant 0 : index
    %48 = vector.load %arg9[%c0_52, %c0_53] : memref<36x128xf32, #tpu.memory_space<vmem>>, vector<16x128xf32>
    %c0_54 = arith.constant 0 : index
    %c0_55 = arith.constant 0 : index
    %c0_56 = arith.constant 0 : index
    %49 = vector.load %arg3[%c0_54, %c0_55, %c0_56] : memref<3x128x128xf32, #tpu.memory_space<vmem>>, vector<1x128x128xf32>
    %50 = vector.shape_cast %49 : vector<1x128x128xf32> to vector<128x128xf32>
    %cst_57 = arith.constant dense<0.000000e+00> : vector<16x128xf32>
    %51 = tpu.matmul %48, %50, %cst_57 {dimension_numbers = #tpu.dot_dimension_numbers<[1], [0], [0], [1], [0, 0, 1, 1], [], []>} : vector<16x128xf32>, vector<128x128xf32>, vector<16x128xf32> -> vector<16x128xf32>
    %c1_58 = arith.constant 1 : index
    %c0_59 = arith.constant 0 : index
    %52 = vector.load %arg9[%c1_58, %c0_59] : memref<36x128xf32, #tpu.memory_space<vmem>>, vector<16x128xf32>
    %c1_60 = arith.constant 1 : index
    %c0_61 = arith.constant 0 : index
    %c0_62 = arith.constant 0 : index
    %53 = vector.load %arg3[%c1_60, %c0_61, %c0_62] : memref<3x128x128xf32, #tpu.memory_space<vmem>>, vector<1x128x128xf32>
    %54 = vector.shape_cast %53 : vector<1x128x128xf32> to vector<128x128xf32>
    %cst_63 = arith.constant dense<0.000000e+00> : vector<16x128xf32>
    %55 = tpu.matmul %52, %54, %cst_63 {dimension_numbers = #tpu.dot_dimension_numbers<[1], [0], [0], [1], [0, 0, 1, 1], [], []>} : vector<16x128xf32>, vector<128x128xf32>, vector<16x128xf32> -> vector<16x128xf32>
    %56 = arith.addf %51, %55 : vector<16x128xf32>
    %c2_64 = arith.constant 2 : index
    %c0_65 = arith.constant 0 : index
    %57 = vector.load %arg9[%c2_64, %c0_65] : memref<36x128xf32, #tpu.memory_space<vmem>>, vector<16x128xf32>
    %c2_66 = arith.constant 2 : index
    %c0_67 = arith.constant 0 : index
    %c0_68 = arith.constant 0 : index
    %58 = vector.load %arg3[%c2_66, %c0_67, %c0_68] : memref<3x128x128xf32, #tpu.memory_space<vmem>>, vector<1x128x128xf32>
    %59 = vector.shape_cast %58 : vector<1x128x128xf32> to vector<128x128xf32>
    %cst_69 = arith.constant dense<0.000000e+00> : vector<16x128xf32>
    %60 = tpu.matmul %57, %59, %cst_69 {dimension_numbers = #tpu.dot_dimension_numbers<[1], [0], [0], [1], [0, 0, 1, 1], [], []>} : vector<16x128xf32>, vector<128x128xf32>, vector<16x128xf32> -> vector<16x128xf32>
    %61 = arith.addf %56, %60 : vector<16x128xf32>
    %c0_70 = arith.constant 0 : index
    %c0_71 = arith.constant 0 : index
    %62 = vector.load %arg4[%c0_70, %c0_71] : memref<1x128xf32, #tpu.memory_space<vmem>>, vector<1x128xf32>
    %63 = vector.broadcast %62 : vector<1x128xf32> to vector<16x128xf32>
    %64 = arith.addf %61, %63 : vector<16x128xf32>
    %cst_72 = arith.constant 0.000000e+00 : f32
    %65 = vector.broadcast %cst_72 : f32 to vector<16x128xf32>
    %66 = arith.maximumf %64, %65 : vector<16x128xf32>
    %c0_73 = arith.constant 0 : index
    %c0_74 = arith.constant 0 : index
    %67 = vector.load %arg0[%c0_73, %c0_74] : memref<32x64xf32, #tpu.memory_space<vmem>>, vector<16x64xf32>
    %c0_75 = arith.constant 0 : index
    %c0_76 = arith.constant 0 : index
    %68 = vector.load %arg5[%c0_75, %c0_76] : memref<64x128xf32, #tpu.memory_space<vmem>>, vector<64x128xf32>
    %cst_77 = arith.constant dense<0.000000e+00> : vector<16x128xf32>
    %69 = tpu.matmul %67, %68, %cst_77 {dimension_numbers = #tpu.dot_dimension_numbers<[1], [0], [0], [1], [0, 0, 1, 1], [], []>} : vector<16x64xf32>, vector<64x128xf32>, vector<16x128xf32> -> vector<16x128xf32>
    %c0_78 = arith.constant 0 : index
    %c0_79 = arith.constant 0 : index
    %70 = vector.load %arg6[%c0_78, %c0_79] : memref<1x128xf32, #tpu.memory_space<vmem>>, vector<1x128xf32>
    %71 = vector.broadcast %70 : vector<1x128xf32> to vector<16x128xf32>
    %72 = arith.addf %69, %71 : vector<16x128xf32>
    %73 = arith.addf %66, %72 : vector<16x128xf32>
    %c0_80 = arith.constant 0 : index
    %c0_81 = arith.constant 0 : index
    %74 = vector.load %arg7[%c0_80, %c0_81] : memref<32x128xf32, #tpu.memory_space<vmem>>, vector<16x128xf32>
    tpu.vector_store %arg7[%c0_80, %c0_81], %73 {strides = array<i32>} : memref<32x128xf32, #tpu.memory_space<vmem>>, vector<16x128xf32>,
    %c18_82 = arith.constant 18 : index
    %c0_83 = arith.constant 0 : index
    %75 = vector.load %arg9[%c18_82, %c0_83] : memref<36x128xf32, #tpu.memory_space<vmem>>, vector<16x128xf32>
    %c0_84 = arith.constant 0 : index
    %c0_85 = arith.constant 0 : index
    %c0_86 = arith.constant 0 : index
    %76 = vector.load %arg3[%c0_84, %c0_85, %c0_86] : memref<3x128x128xf32, #tpu.memory_space<vmem>>, vector<1x128x128xf32>
    %77 = vector.shape_cast %76 : vector<1x128x128xf32> to vector<128x128xf32>
    %cst_87 = arith.constant dense<0.000000e+00> : vector<16x128xf32>
    %78 = tpu.matmul %75, %77, %cst_87 {dimension_numbers = #tpu.dot_dimension_numbers<[1], [0], [0], [1], [0, 0, 1, 1], [], []>} : vector<16x128xf32>, vector<128x128xf32>, vector<16x128xf32> -> vector<16x128xf32>
    %c19_88 = arith.constant 19 : index
    %c0_89 = arith.constant 0 : index
    %79 = vector.load %arg9[%c19_88, %c0_89] : memref<36x128xf32, #tpu.memory_space<vmem>>, vector<16x128xf32>
    %c1_90 = arith.constant 1 : index
    %c0_91 = arith.constant 0 : index
    %c0_92 = arith.constant 0 : index
    %80 = vector.load %arg3[%c1_90, %c0_91, %c0_92] : memref<3x128x128xf32, #tpu.memory_space<vmem>>, vector<1x128x128xf32>
    %81 = vector.shape_cast %80 : vector<1x128x128xf32> to vector<128x128xf32>
    %cst_93 = arith.constant dense<0.000000e+00> : vector<16x128xf32>
    %82 = tpu.matmul %79, %81, %cst_93 {dimension_numbers = #tpu.dot_dimension_numbers<[1], [0], [0], [1], [0, 0, 1, 1], [], []>} : vector<16x128xf32>, vector<128x128xf32>, vector<16x128xf32> -> vector<16x128xf32>
    %83 = arith.addf %78, %82 : vector<16x128xf32>
    %c20_94 = arith.constant 20 : index
    %c0_95 = arith.constant 0 : index
    %84 = vector.load %arg9[%c20_94, %c0_95] : memref<36x128xf32, #tpu.memory_space<vmem>>, vector<16x128xf32>
    %c2_96 = arith.constant 2 : index
    %c0_97 = arith.constant 0 : index
    %c0_98 = arith.constant 0 : index
    %85 = vector.load %arg3[%c2_96, %c0_97, %c0_98] : memref<3x128x128xf32, #tpu.memory_space<vmem>>, vector<1x128x128xf32>
    %86 = vector.shape_cast %85 : vector<1x128x128xf32> to vector<128x128xf32>
    %cst_99 = arith.constant dense<0.000000e+00> : vector<16x128xf32>
    %87 = tpu.matmul %84, %86, %cst_99 {dimension_numbers = #tpu.dot_dimension_numbers<[1], [0], [0], [1], [0, 0, 1, 1], [], []>} : vector<16x128xf32>, vector<128x128xf32>, vector<16x128xf32> -> vector<16x128xf32>
    %88 = arith.addf %83, %87 : vector<16x128xf32>
    %c0_100 = arith.constant 0 : index
    %c0_101 = arith.constant 0 : index
    %89 = vector.load %arg4[%c0_100, %c0_101] : memref<1x128xf32, #tpu.memory_space<vmem>>, vector<1x128xf32>
    %90 = vector.broadcast %89 : vector<1x128xf32> to vector<16x128xf32>
    %91 = arith.addf %88, %90 : vector<16x128xf32>
    %cst_102 = arith.constant 0.000000e+00 : f32
    %92 = vector.broadcast %cst_102 : f32 to vector<16x128xf32>
    %93 = arith.maximumf %91, %92 : vector<16x128xf32>
    %c16_103 = arith.constant 16 : index
    %c0_104 = arith.constant 0 : index
    %94 = vector.load %arg0[%c16_103, %c0_104] : memref<32x64xf32, #tpu.memory_space<vmem>>, vector<16x64xf32>
    %c0_105 = arith.constant 0 : index
    %c0_106 = arith.constant 0 : index
    %95 = vector.load %arg5[%c0_105, %c0_106] : memref<64x128xf32, #tpu.memory_space<vmem>>, vector<64x128xf32>
    %cst_107 = arith.constant dense<0.000000e+00> : vector<16x128xf32>
    %96 = tpu.matmul %94, %95, %cst_107 {dimension_numbers = #tpu.dot_dimension_numbers<[1], [0], [0], [1], [0, 0, 1, 1], [], []>} : vector<16x64xf32>, vector<64x128xf32>, vector<16x128xf32> -> vector<16x128xf32>
    %c0_108 = arith.constant 0 : index
    %c0_109 = arith.constant 0 : index
    %97 = vector.load %arg6[%c0_108, %c0_109] : memref<1x128xf32, #tpu.memory_space<vmem>>, vector<1x128xf32>
    %98 = vector.broadcast %97 : vector<1x128xf32> to vector<16x128xf32>
    %99 = arith.addf %96, %98 : vector<16x128xf32>
    %100 = arith.addf %93, %99 : vector<16x128xf32>
    %c16_110 = arith.constant 16 : index
    %c0_111 = arith.constant 0 : index
    %101 = vector.load %arg7[%c16_110, %c0_111] : memref<32x128xf32, #tpu.memory_space<vmem>>, vector<16x128xf32>
    tpu.vector_store %arg7[%c16_110, %c0_111], %100 {strides = array<i32>} : memref<32x128xf32, #tpu.memory_space<vmem>>, vector<16x128xf32>,
    return
  }
}

</mosaic_0001>

<bundles_post_ra>
// kernel: tile.18
= control target key start
LH: loop header
LB: loop body
LE: loop exit
PB: predicated region body
PF: predicated region fallthrough
CT: control target
= control target key end

     0   :  { %s28_s0 = inlined_call_operand.vmem [shape: f32[8], index: 0, kind: input, shape index: {}]   ;;  %s29_s1 = inlined_call_operand.vmem [shape: f32[16,8], index: 1, kind: output, shape index: {}]  }
   0x1   :  { %v4_v0 = vld [vmem:[%s28_s0] ss:$0 sm:$0xff] }
   0x2   :  { %5 = vst [vmem:[%s29_s1] sm:$0xff] %v4_v0  ;;  %8 = vst [vmem:[%s29_s1 + $0x8] sm:$0xff] %v4_v0 }

// kernel: tile.19
= control target key start
LH: loop header
LB: loop body
LE: loop exit
PB: predicated region body
PF: predicated region fallthrough
CT: control target
= control target key end

     0   :  { %s133_s10 = smov 120   ;;  %s134_s11 = smov 104   ;;  %vm3_vm0 = vcmask 64512   ;;  %vm9_vm1 = vcmask 1048512   ;;  %vm15_vm2 = vcmask 982912   ;;  %vm21_vm3 = vcmask 917312   ;;  %s209_s0 = inlined_call_operand.vmem [shape: f32[16,8], index: 0, kind: input, shape index: {}]   ;;  %s210_s1 = inlined_call_operand.vmem [shape: f32[1,128], index: 1, kind: output, shape index: {}]  }
   0x1   :  { %v103_v0 = vld [vmem:[%s209_s0 + $0xf] sm:$0x1]   ;;  %v105_v1 = vld [vmem:[%s209_s0 + $0xd] sm:$0x1]   ;;  %v104_v2 = vld [vmem:[%s209_s0 + $0xe] sm:$0x1]  }
   0x2   :  { %7 = vrot.lane.b32.xlu0 %v103_v0, %s133_s10  ;;  %19 = vrot.lane.b32.xlu1 %v105_v1, %s134_s11  ;;  %v106_v3 = vld [vmem:[%s209_s0 + $0xc] sm:$0x1]   ;;  %s135_s16 = smov 112   ;;  %s136_s17 = smov 96   ;;  %v107_v4 = vld [vmem:[%s209_s0 + $0xb] sm:$0x1]  }
   0x3   :  { %v108_v5 = vld [vmem:[%s209_s0 + $0xa] sm:$0x1]   ;;  %v2_v6 = vld [vmem:[%s209_s0] sm:$0x1]   ;;  %s137_s24 = smov 88   ;;  %s138_s25 = smov 80  }
   0x4   :  { %4 = vst.msk [vmem:[#allocation0] sm:$0x1] %vm3_vm0, %v2_v6   ;;  %v109_v7 = vld [vmem:[%s209_s0 + $0x9] sm:$0x1]   ;;  %v110_v8 = vld [vmem:[%s209_s0 + $0x8] sm:$0x1]  }
   0x5   :  { %s139_s30 = smov 72   ;;  %s140_s2 = smov 64   ;;  %v111_v9 = vld [vmem:[%s209_s0 + $0x7] sm:$0x1]   ;;  %v112_v10 = vld [vmem:[%s209_s0 + $0x6] sm:$0x1]  }
   0x6   :  { %13 = vrot.lane.b32.xlu0 %v104_v2, %s135_s16  ;;  %25 = vrot.lane.b32.xlu1 %v106_v3, %s136_s17  ;;  %s141_s7 = smov 56   ;;  %s142_s8 = smov 48   ;;  %v113_v11 = vld [vmem:[%s209_s0 + $0x5] sm:$0x1]   ;;  %v114_v12 = vld [vmem:[%s209_s0 + $0x4] sm:$0x1]  }
   0x7   :  { %s143_s13 = smov 40   ;;  %s144_s14 = smov 32   ;;  %v115_v13 = vld [vmem:[%s209_s0 + $0x3] sm:$0x1]   ;;  %v116_v14 = vld [vmem:[%s209_s0 + $0x2] sm:$0x1]  }
   0x8   :  { %s145_s19 = smov 24   ;;  %s146_s20 = smov 16   ;;  %v117_v15 = vld [vmem:[%s209_s0 + $0x1] sm:$0x1]   ;;  %vm27_vm4 = vcmask 851712   ;;  %vm33_vm5 = vcmask 786112  }
   0x9   :  { %s147_s0 = smov 8   ;;  %vm39_vm6 = vcmask 720512   ;;  %vm45_vm7 = vcmask 654912   ;;  %vm51_vm8 = vcmask 589312   ;;  %vm57_vm9 = vcmask 523712  }
   0xa   :  { %31 = vrot.lane.b32.xlu0 %v107_v4, %s137_s24  ;;  %37 = vrot.lane.b32.xlu1 %v108_v5, %s138_s25  ;;  %vm63_vm10 = vcmask 458112   ;;  %vm69_vm11 = vcmask 392512   ;;  %vm75_vm12 = vcmask 326912   ;;  %vm81_vm13 = vcmask 261312  }
   0xb   :  { %vm87_vm14 = vcmask 195712   ;;  %vm93_vm15 = vcmask 130112  }
   0xe   :  { %43 = vrot.lane.b32.xlu0 %v109_v7, %s139_s30  ;;  %49 = vrot.lane.b32.xlu1 %v110_v8, %s140_s2 }
  0x12   :  { %55 = vrot.lane.b32.xlu0 %v111_v9, %s141_s7  ;;  %61 = vrot.lane.b32.xlu1 %v112_v10, %s142_s8 }
  0x16   :  { %67 = vrot.lane.b32.xlu0 %v113_v11, %s143_s13  ;;  %73 = vrot.lane.b32.xlu1 %v114_v12, %s144_s14 }
  0x1a   :  { %79 = vrot.lane.b32.xlu0 %v115_v13, %s145_s19  ;;  %85 = vrot.lane.b32.xlu1 %v116_v14, %s146_s20 }
  0x1e   :  { %91 = vrot.lane.b32.xlu0 %v117_v15, %s147_s0 }
  0x74   :  { %v8_v16 = vpop.permute.xlu0 %7   ;;  %v20_v17 = vpop.permute.xlu1 %19  }
  0x75   :  { %10 = vst.msk [vmem:[#allocation0] sm:$0x1] %vm9_vm1, %v8_v16  }
  0x78   :  { %v14_v18 = vpop.permute.xlu0 %13   ;;  %v26_v19 = vpop.permute.xlu1 %25  }
  0x79   :  { %16 = vst.msk [vmem:[#allocation0] sm:$0x1] %vm15_vm2, %v14_v18  }
  0x7a   :  { %22 = vst.msk [vmem:[#allocation0] sm:$0x1] %vm21_vm3, %v20_v17  }
  0x7b   :  { %28 = vst.msk [vmem:[#allocation0] sm:$0x1] %vm27_vm4, %v26_v19  }
  0x7c   :  { %v32_v20 = vpop.permute.xlu0 %31   ;;  %v38_v21 = vpop.permute.xlu1 %37  }
  0x7d   :  { %34 = vst.msk [vmem:[#allocation0] sm:$0x1] %vm33_vm5, %v32_v20  }
  0x7e   :  { %40 = vst.msk [vmem:[#allocation0] sm:$0x1] %vm39_vm6, %v38_v21  }
  0x80   :  { %v44_v22 = vpop.permute.xlu0 %43   ;;  %v50_v23 = vpop.permute.xlu1 %49  }
  0x81   :  { %46 = vst.msk [vmem:[#allocation0] sm:$0x1] %vm45_vm7, %v44_v22  }
  0x82   :  { %52 = vst.msk [vmem:[#allocation0] sm:$0x1] %vm51_vm8, %v50_v23  }
  0x84   :  { %v56_v24 = vpop.permute.xlu0 %55   ;;  %v62_v25 = vpop.permute.xlu1 %61  }
  0x85   :  { %58 = vst.msk [vmem:[#allocation0] sm:$0x1] %vm57_vm9, %v56_v24  }
  0x86   :  { %64 = vst.msk [vmem:[#allocation0] sm:$0x1] %vm63_vm10, %v62_v25  }
  0x88   :  { %v68_v26 = vpop.permute.xlu0 %67   ;;  %v74_v27 = vpop.permute.xlu1 %73  }
  0x89   :  { %70 = vst.msk [vmem:[#allocation0] sm:$0x1] %vm69_vm11, %v68_v26  }
  0x8a   :  { %76 = vst.msk [vmem:[#allocation0] sm:$0x1] %vm75_vm12, %v74_v27  }
  0x8c   :  { %v80_v28 = vpop.permute.xlu0 %79   ;;  %v86_v29 = vpop.permute.xlu1 %85  }
  0x8d   :  { %82 = vst.msk [vmem:[#allocation0] sm:$0x1] %vm81_vm13, %v80_v28  }
  0x8e   :  { %88 = vst.msk [vmem:[#allocation0] sm:$0x1] %vm87_vm14, %v86_v29  }
  0x90   :  { %v92_v30 = vpop.permute.xlu0 %91  }
  0x91   :  { %94 = vst.msk [vmem:[#allocation0] sm:$0x1] %vm93_vm15, %v92_v30  }
  0x98   :  { %v99_v31 = vld [vmem:[#allocation0] sm:$0x1] }
  0x99   :  { %102 = vst [vmem:[%s210_s1] sm:$0x1] %v99_v31 }

// kernel: bottleneck_forward.1
= control target key start
LH: loop header
LB: loop body
LE: loop exit
PB: predicated region body
PF: predicated region fallthrough
CT: control target
= control target key end

     0   :  { %vm26_vm0 = vcmask 523264   ;;  %vm31_vm1 = vcmask 519168   ;;  %v2087_v3 = vmov 0.0   ;;  %s2886_s1 = inlined_call_operand.vmem [shape: f32[3,64,128], index: 1, kind: input, shape index: {}]   ;;  %s2887_s0 = inlined_call_operand.vmem [shape: f32[32,64], index: 0, kind: input, shape index: {}]   ;;  %s2888_s3 = inlined_call_operand.vmem [shape: f32[3,128,128], index: 3, kind: input, shape index: {}]   ;;  %s2889_s5 = inlined_call_operand.vmem [shape: f32[64,128], index: 5, kind: input, shape index: {}]   ;;  %s2890_s2 = inlined_call_operand.vmem [shape: f32[1,128], index: 2, kind: input, shape index: {}]   ;;  %s2891_s4 = inlined_call_operand.vmem [shape: f32[1,128], index: 4, kind: input, shape index: {}]   ;;  %s2892_s6 = inlined_call_operand.vmem [shape: f32[1,128], index: 6, kind: input, shape index: {}]   ;;  %s2893_s7 = inlined_call_operand.vmem [shape: f32[32,128], index: 7, kind: output, shape index: {}]  }
   0x1   :  { %v2131_v0 = vld [vmem:[%s2886_s1 + $0x78] sm:$0xff]  ;;  %v2141_v2 = vld [vmem:[%s2886_s1 + $0x70] sm:$0xff]  ;;  %27 = vst.msk [vmem:[#allocation2] sm:$0xff] %vm26_vm0, %v2087_v3  ;;  %28 = vst.msk [vmem:[#allocation2 + $0x8] sm:$0xff] %vm26_vm0, %v2087_v3 }
   0x2   :  { %v2136_v1 = vld [vmem:[%s2886_s1 + $0x38] sm:$0xff]  ;;  %29 = vst.msk [vmem:[#allocation2 + $0x10] sm:$0xff] %vm26_vm0, %v2087_v3  ;;  %30 = vst.msk [vmem:[#allocation2 + $0x18] sm:$0xff] %vm26_vm0, %v2087_v3  ;;  %1724 = vmatprep.subr.mxu0 %v2131_v0  ;;  %v2152_v4 = vld [vmem:[%s2886_s1 + $0x30] sm:$0xff] }
   0x3   :  { %33 = vst [vmem:[#allocation3] sm:$0xff] %v2087_v3  ;;  %34 = vst [vmem:[#allocation3 + $0x8] sm:$0xff] %v2087_v3  ;;  %1743 = vmatprep.subr.mxu1 %v2136_v1  ;;  %1725 = vmatpush3.msra.mxu0 %v2131_v0  ;;  %v2159_v5 = vld [vmem:[%s2886_s1 + $0x68] sm:$0xff]  ;;  %v2173_v7 = vld [vmem:[%s2886_s1 + $0x60] sm:$0xff] }
   0x4   :  { %35 = vst [vmem:[#allocation3 + $0x10] sm:$0xff] %v2087_v3  ;;  %36 = vst [vmem:[#allocation3 + $0x18] sm:$0xff] %v2087_v3  ;;  %1744 = vmatpush3.msra.mxu1 %v2136_v1  ;;  %v2164_v6 = vld [vmem:[%s2886_s1 + $0x28] sm:$0xff]  ;;  %1726 = vmatprep.subr.mxu0 %v2141_v2  ;;  %v2178_v8 = vld [vmem:[%s2886_s1 + $0x20] sm:$0xff] }
   0x5   :  { %37 = vst [vmem:[#allocation3 + $0x20] sm:$0xf] %v2087_v3  ;;  %32 = vst.msk [vmem:[#allocation2 + $0x20] sm:$0xf] %vm31_vm1, %v2087_v3  ;;  %1745 = vmatprep.subr.mxu1 %v2152_v4  ;;  %1727 = vmatpush3.msra.mxu0 %v2141_v2  ;;  %v2185_v9 = vld [vmem:[%s2887_s0] sm:$0xff]  ;;  %v2190_v10 = vld [vmem:[%s2887_s0 + $0x8] sm:$0xff] }
   0x6   :  { %1746 = vmatpush3.msra.mxu1 %v2152_v4  ;;  %1728 = vmatprep.subr.mxu0 %v2159_v5  ;;  %v2197_v11 = vld [vmem:[%s2886_s1 + $0x58] sm:$0xff]  ;;  %40 = vst.msk [vmem:[#allocation2 + $0x1] sm:$0xff] %vm26_vm0, %v2185_v9  ;;  %41 = vst.msk [vmem:[#allocation2 + $0x9] sm:$0xff] %vm26_vm0, %v2190_v10  ;;  %v2215_v13 = vld [vmem:[%s2886_s1 + $0x50] sm:$0xff] }
   0x7   :  { %1747 = vmatprep.subr.mxu1 %v2164_v6  ;;  %1729 = vmatpush3.msra.mxu0 %v2159_v5  ;;  %v2202_v12 = vld [vmem:[%s2886_s1 + $0x18] sm:$0xff]  ;;  %v2220_v14 = vld [vmem:[%s2886_s1 + $0x10] sm:$0xff]  ;;  %v2241_v17 = vld [vmem:[%s2886_s1 + $0x48] sm:$0xff] }
   0x8   :  { %1748 = vmatpush3.msra.mxu1 %v2164_v6  ;;  %1730 = vmatprep.subr.mxu0 %v2173_v7  ;;  %v2225_v15 = vld [vmem:[%s2887_s0 + $0x10] sm:$0xff]  ;;  %v2234_v16 = vld [vmem:[%s2887_s0 + $0x18] sm:$0xff]  ;;  %v2246_v18 = vld [vmem:[%s2886_s1 + $0x8] sm:$0xff] }
   0x9   :  { %1749 = vmatprep.subr.mxu1 %v2178_v8  ;;  %1731 = vmatpush3.msra.mxu0 %v2173_v7  ;;  %44 = vst.msk [vmem:[#allocation2 + $0x13] sm:$0xff] %vm26_vm0, %v2225_v15  ;;  %45 = vst.msk [vmem:[#allocation2 + $0x1b] sm:$0xff] %vm26_vm0, %v2234_v16  ;;  %v2257_v19 = vld [vmem:[%s2886_s1 + $0x40] sm:$0xff]  ;;  %v1437_v25 = vld [vmem:[%s2886_s1 + $0xb8] sm:$0xff] }
   0xa   :  { %1750 = vmatpush3.msra.mxu1 %v2178_v8  ;;  %1732 = vmatprep.subr.mxu0 %v2197_v11  ;;  %v2262_v20 = vld [vmem:[%s2886_s1] sm:$0xff]  ;;  %v1436_v27 = vld [vmem:[%s2886_s1 + $0xb0] sm:$0xff]  ;;  %v1435_v28 = vld [vmem:[%s2886_s1 + $0xa8] sm:$0xff] }
   0xb   :  { %1751 = vmatprep.subr.mxu1 %v2202_v12  ;;  %1733 = vmatpush3.msra.mxu0 %v2197_v11  ;;  %v1434_v29 = vld [vmem:[%s2886_s1 + $0xa0] sm:$0xff]  ;;  %v1433_v30 = vld [vmem:[%s2886_s1 + $0x98] sm:$0xff]  ;;  %v1432_v31 = vld [vmem:[%s2886_s1 + $0x90] sm:$0xff] }
   0xc   :  { %1752 = vmatpush3.msra.mxu1 %v2202_v12  ;;  %1734 = vmatprep.subr.mxu0 %v2215_v13  ;;  %v1431_v32 = vld [vmem:[%s2886_s1 + $0x88] sm:$0xff]  ;;  %v1430_v33 = vld [vmem:[%s2886_s1 + $0x80] sm:$0xff]  ;;  %v2343_v41 = vld [vmem:[%s2888_s3 + $0xf8] sm:$0xff] }
   0xd   :  { %1753 = vmatprep.subr.mxu1 %v2220_v14  ;;  %1735 = vmatpush3.msra.mxu0 %v2215_v13  ;;  %v56_v21 = vld [vmem:[#allocation2 + $0x1] sm:$0xff]  ;;  %v57_v23 = vld [vmem:[#allocation2 + $0x9] sm:$0xff]  ;;  %v2370_v45 = vld [vmem:[%s2888_s3 + $0x78] sm:$0xff] }
   0xe   :  { %1754 = vmatpush3.msra.mxu1 %v2220_v14  ;;  %1736 = vmatprep.subr.mxu0 %v2241_v17  ;;  %v46_v22 = vld [vmem:[#allocation2] sm:$0xff]  ;;  %v47_v24 = vld [vmem:[#allocation2 + $0x8] sm:$0xff]  ;;  %v2350_v42 = vld [vmem:[%s2888_s3 + $0xf0] sm:$0xff] }
   0xf   :  { %1755 = vmatprep.subr.mxu1 %v2246_v18  ;;  %1737 = vmatpush3.msra.mxu0 %v2241_v17  ;;  %v229_v26 = vld [vmem:[#allocation2 + $0x2] sm:$0xff]  ;;  %v230_v34 = vld [vmem:[#allocation2 + $0xa] sm:$0xff]  ;;  %v2376_v46 = vld [vmem:[%s2888_s3 + $0xd8] sm:$0xff] }
  0x10   :  { %1756 = vmatpush3.msra.mxu1 %v2246_v18  ;;  %1738 = vmatprep.subr.mxu0 %v2257_v19  ;;  %v346_v35 = vld [vmem:[#allocation2 + $0x13] sm:$0xff]  ;;  %v347_v36 = vld [vmem:[#allocation2 + $0x1b] sm:$0xff]  ;;  %v2357_v43 = vld [vmem:[%s2888_s3 + $0xe8] sm:$0xff] }
  0x11   :  { %1757 = vmatprep.subr.mxu1 %v2262_v20  ;;  %1739 = vmatpush3.msra.mxu0 %v2257_v19  ;;  %v336_v37 = vld [vmem:[#allocation2 + $0x12] sm:$0xff]  ;;  %v337_v38 = vld [vmem:[#allocation2 + $0x1a] sm:$0xff]  ;;  %v2389_v48 = vld [vmem:[%s2888_s3 + $0x68] sm:$0xff] }
  0x12   :  { %1740 = vmatprep.mubr.msk.f32.mxu0 %vm26_vm0, %v56_v21  ;;  %1758 = vmatpush3.msra.mxu1 %v2262_v20  ;;  %v518_v39 = vld [vmem:[#allocation2 + $0x14] sm:$0xff]  ;;  %v519_v40 = vld [vmem:[#allocation2 + $0x1c] sm:$0xff]  ;;  %v2408_v51 = vld [vmem:[%s2888_s3 + $0xc8] sm:$0xff] }
  0x13   :  { %1759 = vmatprep.mubr.msk.f32.mxu1 %vm26_vm0, %v46_v22  ;;  %1741 = vmatmul.mubr.msk.f32.vlgmr.msra.gmra.mxu0 %vm26_vm0, %v57_v23  ;;  %v2364_v44 = vld [vmem:[%s2888_s3 + $0xe0] sm:$0xff]  ;;  %v2384_v47 = vld [vmem:[%s2888_s3 + $0x70] sm:$0xff]  ;;  %v2421_v53 = vld [vmem:[%s2888_s3 + $0x58] sm:$0xff] }
  0x14   :  { %1760 = vmatmul.mubr.msk.f32.vlgmr.msra.gmra.mxu1 %vm26_vm0, %v47_v24  ;;  %1762 = vmatprep.subr.mxu0 %v1437_v25  ;;  %v2396_v49 = vld [vmem:[%s2888_s3 + $0xd0] sm:$0xff]  ;;  %v2402_v50 = vld [vmem:[%s2888_s3 + $0x60] sm:$0xff]  ;;  %v2436_v55 = vld [vmem:[%s2888_s3 + $0xb8] sm:$0xff] }
  0x15   :  { %1778 = vmatprep.mubr.msk.f32.mxu0 %vm26_vm0, %v229_v26  ;;  %1763 = vmatpush3.msra.mxu0 %v1437_v25  ;;  %v2415_v52 = vld [vmem:[%s2888_s3 + $0xc0] sm:$0xff]  ;;  %v2430_v54 = vld [vmem:[%s2888_s3 + $0x50] sm:$0xff]  ;;  %v2444_v56 = vld [vmem:[%s2888_s3 + $0x48] sm:$0xff] }
  0x16   :  { %1781 = vmatprep.subr.mxu1 %v2131_v0  ;;  %1764 = vmatprep.subr.mxu0 %v1436_v27  ;;  %v2450_v57 = vld [vmem:[%s2888_s3 + $0xb0] sm:$0xff]  ;;  %v2458_v58 = vld [vmem:[%s2888_s3 + $0x40] sm:$0xff]  ;;  %v2464_v59 = vld [vmem:[%s2888_s3 + $0xa8] sm:$0xff] }
  0x17   :  { %1782 = vmatpush3.msra.mxu1 %v2131_v0  ;;  %1765 = vmatpush3.msra.mxu0 %v1436_v27  ;;  %v2473_v60 = vld [vmem:[%s2888_s3 + $0xa0] sm:$0xff]  ;;  %v2481_v61 = vld [vmem:[%s2888_s3 + $0x38] sm:$0xff]  ;;  %v2495_v63 = vld [vmem:[%s2888_s3 + $0x30] sm:$0xff] }
  0x18   :  { %1783 = vmatprep.subr.mxu1 %v2141_v2  ;;  %1766 = vmatprep.subr.mxu0 %v1435_v28  ;;  %v2487_v62 = vld [vmem:[%s2888_s3 + $0x98] sm:$0xff]  ;;  %v2501_v0 = vld [vmem:[%s2888_s3 + $0x90] sm:$0xff]  ;;  %v2523_v3 = vld [vmem:[%s2888_s3 + $0x20] sm:$0xff] }
  0x19   :  { %1784 = vmatpush3.msra.mxu1 %v2141_v2  ;;  %1767 = vmatpush3.msra.mxu0 %v1435_v28  ;;  %v2515_v2 = vld [vmem:[%s2888_s3 + $0x88] sm:$0xff]  ;;  %v2579_v21 = vld [vmem:[%s2890_s2] ss:$0 sm:$0xff] }
  0x1a   :  { %1785 = vmatprep.subr.mxu1 %v2159_v5  ;;  %1768 = vmatprep.subr.mxu0 %v1434_v29 }
  0x1b   :  { %1786 = vmatpush3.msra.mxu1 %v2159_v5  ;;  %1769 = vmatpush3.msra.mxu0 %v1434_v29  ;;  %v2537_v5 = vld [vmem:[%s2888_s3 + $0x18] sm:$0xff] }
  0x1c   :  { %1787 = vmatprep.subr.mxu1 %v2173_v7  ;;  %1770 = vmatprep.subr.mxu0 %v1433_v30 }
  0x1d   :  { %1788 = vmatpush3.msra.mxu1 %v2173_v7  ;;  %1771 = vmatpush3.msra.mxu0 %v1433_v30  ;;  %v2549_v7 = vld [vmem:[%s2888_s3 + $0x10] sm:$0xff] }
  0x1e   :  { %1789 = vmatprep.subr.mxu1 %v2197_v11  ;;  %1772 = vmatprep.subr.mxu0 %v1432_v31 }
  0x1f   :  { %1790 = vmatpush3.msra.mxu1 %v2197_v11  ;;  %1773 = vmatpush3.msra.mxu0 %v1432_v31  ;;  %v2564_v11 = vld [vmem:[%s2888_s3] sm:$0xff] }
  0x20   :  { %1791 = vmatprep.subr.mxu1 %v2215_v13  ;;  %1774 = vmatprep.subr.mxu0 %v1431_v32 }
  0x21   :  { %1792 = vmatpush3.msra.mxu1 %v2215_v13  ;;  %1775 = vmatpush3.msra.mxu0 %v1431_v32 }
  0x22   :  { %1793 = vmatprep.subr.mxu1 %v2241_v17  ;;  %1776 = vmatprep.subr.mxu0 %v1430_v33 }
  0x23   :  { %1794 = vmatpush3.msra.mxu1 %v2241_v17  ;;  %1777 = vmatpush3.msra.mxu0 %v1430_v33 }
  0x24   :  { %1795 = vmatprep.subr.mxu1 %v2257_v19  ;;  %1779 = vmatmul.mubr.msk.f32.vlgmr.msra.gmra.mxu0 %vm26_vm0, %v230_v34  ;;  %v2606_v34 = vld [vmem:[%s2888_s3 + $0x158] sm:$0xff] }
  0x25   :  { %1800 = vmatprep.subr.mxu0 %v2136_v1  ;;  %1796 = vmatpush3.msra.mxu1 %v2257_v19 }
  0x26   :  { %1801 = vmatpush3.msra.mxu0 %v2136_v1  ;;  %1797 = vmatprep.mubr.msk.f32.mxu1 %vm26_vm0, %v346_v35  ;;  %v2509_v1 = vld [vmem:[%s2888_s3 + $0x28] sm:$0xff] }
  0x27   :  { %1802 = vmatprep.subr.mxu0 %v2152_v4  ;;  %1819 = vmatprep.subr.mxu1 %v1437_v25 }
  0x28   :  { %1798 = vmatmul.mubr.msk.f32.vlgmr.msra.gmra.mxu1 %vm26_vm0, %v347_v36  ;;  %1803 = vmatpush3.msra.mxu0 %v2152_v4  ;;  %v2529_v4 = vld [vmem:[%s2888_s3 + $0x80] sm:$0xff] }
  0x29   :  { %1820 = vmatpush3.msra.mxu1 %v1437_v25  ;;  %1804 = vmatprep.subr.mxu0 %v2164_v6 }
  0x2a   :  { %1821 = vmatprep.subr.mxu1 %v1436_v27  ;;  %1805 = vmatpush3.msra.mxu0 %v2164_v6  ;;  %v2543_v6 = vld [vmem:[%s2888_s3 + $0x178] sm:$0xff] }
  0x2b   :  { %1822 = vmatpush3.msra.mxu1 %v1436_v27  ;;  %1806 = vmatprep.subr.mxu0 %v2178_v8 }
  0x2c   :  { %1823 = vmatprep.subr.mxu1 %v1435_v28  ;;  %1807 = vmatpush3.msra.mxu0 %v2178_v8  ;;  %v2556_v8 = vld [vmem:[%s2888_s3 + $0x8] sm:$0xff] }
  0x2d   :  { %1824 = vmatpush3.msra.mxu1 %v1435_v28  ;;  %1808 = vmatprep.subr.mxu0 %v2202_v12 }
  0x2e   :  { %1825 = vmatprep.subr.mxu1 %v1434_v29  ;;  %1809 = vmatpush3.msra.mxu0 %v2202_v12  ;;  %v2573_v12 = vld [vmem:[%s2889_s5 + $0x38] sm:$0xff] }
  0x2f   :  { %1826 = vmatpush3.msra.mxu1 %v1434_v29  ;;  %1810 = vmatprep.subr.mxu0 %v2220_v14 }
  0x30   :  { %1827 = vmatprep.subr.mxu1 %v1433_v30  ;;  %1811 = vmatpush3.msra.mxu0 %v2220_v14 }
  0x31   :  { %1828 = vmatpush3.msra.mxu1 %v1433_v30  ;;  %1812 = vmatprep.subr.mxu0 %v2246_v18  ;;  %v2586_v30 = vld [vmem:[%s2888_s3 + $0x170] sm:$0xff] }
  0x32   :  { %1829 = vmatprep.subr.mxu1 %v1432_v31  ;;  %1813 = vmatpush3.msra.mxu0 %v2246_v18 }
  0x33   :  { %1830 = vmatpush3.msra.mxu1 %v1432_v31  ;;  %1814 = vmatprep.subr.mxu0 %v2262_v20  ;;  %v2592_v31 = vld [vmem:[%s2888_s3 + $0x168] sm:$0xff] }
  0x34   :  { %1831 = vmatprep.subr.mxu1 %v1431_v32  ;;  %1815 = vmatpush3.msra.mxu0 %v2262_v20 }
  0x35   :  { %1816 = vmatprep.mubr.msk.f32.mxu0 %vm26_vm0, %v336_v37  ;;  %1832 = vmatpush3.msra.mxu1 %v1431_v32 }
  0x36   :  { %1817 = vmatmul.mubr.msk.f32.vlgmr.msra.gmra.mxu0 %vm26_vm0, %v337_v38  ;;  %1833 = vmatprep.subr.mxu1 %v1430_v33 }
  0x37   :  { %1835 = vmatprep.mubr.msk.f32.mxu1 %vm26_vm0, %v518_v39  ;;  %1834 = vmatpush3.msra.mxu1 %v1430_v33  ;;  %v2599_v33 = vld [vmem:[%s2888_s3 + $0x160] sm:$0xff]  ;;  %v2612_v39 = vld [vmem:[%s2889_s5 + $0x30] sm:$0xff] }
  0x38   :  { %1836 = vmatmul.mubr.msk.f32.vlgmr.msra.gmra.mxu1 %vm26_vm0, %v519_v40  ;;  %1838 = vmatprep.subr.mxu0 %v2343_v41 }
  0x39   :  { %1839 = vmatpush3.msra.mxu0 %v2343_v41  ;;  %1873 = vmatprep.subr.mxu1 %v2370_v45 }
  0x3a   :  { %1840 = vmatprep.subr.mxu0 %v2350_v42  ;;  %1874 = vmatpush3.msra.mxu1 %v2370_v45 }
  0x3b   :  { %1841 = vmatpush3.msra.mxu0 %v2350_v42  ;;  %1875 = vmatprep.subr.mxu1 %v2384_v47 }
  0x3c   :  { %1842 = vmatprep.subr.mxu0 %v2357_v43  ;;  %1876 = vmatpush3.msra.mxu1 %v2384_v47 }
  0x3d   :  { %1843 = vmatpush3.msra.mxu0 %v2357_v43  ;;  %1877 = vmatprep.subr.mxu1 %v2389_v48 }
  0x3e   :  { %1844 = vmatprep.subr.mxu0 %v2364_v44  ;;  %1878 = vmatpush3.msra.mxu1 %v2389_v48 }
  0x3f   :  { %1845 = vmatpush3.msra.mxu0 %v2364_v44  ;;  %1879 = vmatprep.subr.mxu1 %v2402_v50 }
  0x40   :  { %1846 = vmatprep.subr.mxu0 %v2376_v46  ;;  %1880 = vmatpush3.msra.mxu1 %v2402_v50 }
  0x41   :  { %1847 = vmatpush3.msra.mxu0 %v2376_v46  ;;  %1881 = vmatprep.subr.mxu1 %v2421_v53 }
  0x42   :  { %1848 = vmatprep.subr.mxu0 %v2396_v49  ;;  %1882 = vmatpush3.msra.mxu1 %v2421_v53 }
  0x43   :  { %1849 = vmatpush3.msra.mxu0 %v2396_v49  ;;  %1883 = vmatprep.subr.mxu1 %v2430_v54 }
  0x44   :  { %1850 = vmatprep.subr.mxu0 %v2408_v51  ;;  %1884 = vmatpush3.msra.mxu1 %v2430_v54 }
  0x45   :  { %1851 = vmatpush3.msra.mxu0 %v2408_v51  ;;  %1885 = vmatprep.subr.mxu1 %v2444_v56 }
  0x46   :  { %1852 = vmatprep.subr.mxu0 %v2415_v52  ;;  %1886 = vmatpush3.msra.mxu1 %v2444_v56 }
  0x47   :  { %1853 = vmatpush3.msra.mxu0 %v2415_v52  ;;  %1887 = vmatprep.subr.mxu1 %v2458_v58 }
  0x48   :  { %1854 = vmatprep.subr.mxu0 %v2436_v55  ;;  %1888 = vmatpush3.msra.mxu1 %v2458_v58 }
  0x49   :  { %1855 = vmatpush3.msra.mxu0 %v2436_v55  ;;  %1889 = vmatprep.subr.mxu1 %v2481_v61 }
  0x4a   :  { %1856 = vmatprep.subr.mxu0 %v2450_v57  ;;  %1890 = vmatpush3.msra.mxu1 %v2481_v61 }
  0x4b   :  { %1857 = vmatpush3.msra.mxu0 %v2450_v57  ;;  %1891 = vmatprep.subr.mxu1 %v2495_v63 }
  0x4c   :  { %1858 = vmatprep.subr.mxu0 %v2464_v59  ;;  %1892 = vmatpush3.msra.mxu1 %v2495_v63 }
  0x4d   :  { %1859 = vmatpush3.msra.mxu0 %v2464_v59  ;;  %1893 = vmatprep.subr.mxu1 %v2509_v1 }
  0x4e   :  { %1860 = vmatprep.subr.mxu0 %v2473_v60  ;;  %1894 = vmatpush3.msra.mxu1 %v2509_v1 }
  0x4f   :  { %1861 = vmatpush3.msra.mxu0 %v2473_v60  ;;  %1895 = vmatprep.subr.mxu1 %v2523_v3 }
  0x50   :  { %1862 = vmatprep.subr.mxu0 %v2487_v62  ;;  %1896 = vmatpush3.msra.mxu1 %v2523_v3 }
  0x51   :  { %1863 = vmatpush3.msra.mxu0 %v2487_v62  ;;  %1897 = vmatprep.subr.mxu1 %v2537_v5 }
  0x52   :  { %1864 = vmatprep.subr.mxu0 %v2501_v0  ;;  %1898 = vmatpush3.msra.mxu1 %v2537_v5 }
  0x53   :  { %1865 = vmatpush3.msra.mxu0 %v2501_v0  ;;  %1899 = vmatprep.subr.mxu1 %v2549_v7 }
  0x54   :  { %1866 = vmatprep.subr.mxu0 %v2515_v2  ;;  %1900 = vmatpush3.msra.mxu1 %v2549_v7 }
  0x55   :  { %1867 = vmatpush3.msra.mxu0 %v2515_v2  ;;  %1901 = vmatprep.subr.mxu1 %v2556_v8 }
  0x56   :  { %1868 = vmatprep.subr.mxu0 %v2529_v4  ;;  %1902 = vmatpush3.msra.mxu1 %v2556_v8 }
  0x57   :  { %1869 = vmatpush3.msra.mxu0 %v2529_v4  ;;  %1903 = vmatprep.subr.mxu1 %v2564_v11 }
  0x58   :  { %1908 = vmatprep.subr.mxu0 %v2543_v6  ;;  %1904 = vmatpush3.msra.mxu1 %v2564_v11 }
  0x59   :  { %1943 = vmatprep.subr.mxu1 %v2573_v12 }
  0xd3   :  { %v1742_v13 = vpop.f32.mrf.mxu0 }
  0xd4   :  { %v1761_v14 = vpop.f32.mrf.mxu1 }
  0xd5   :  { %v139_v17 = vpop.f32.mrf.mxu0  ;;  %v226_v19 = vadd.f32 %v1761_v14, %v1742_v13  ;;  %v2618_v13 = vld [vmem:[%s2888_s3 + $0x150] sm:$0xff] }
  0xd6   :  { %v220_v18 = vpop.f32.mrf.mxu1 }
  0xd7   :  { %v221_v22 = vadd.f32 %v220_v18, %v139_v17  ;;  %v2624_v17 = vld [vmem:[%s2889_s5 + $0x28] sm:$0xff] }
  0xe4   :  { %v1780_v20 = vpop.f32.mrf.mxu0 }
  0xe5   :  { %v322_v23 = vadd.f32 %v1780_v20, %v226_v19  ;;  %v2632_v19 = vld [vmem:[%s2888_s3 + $0x148] sm:$0xff] }
  0xe6   :  { %v312_v24 = vpop.f32.mrf.mxu0 }
  0xe7   :  { %v331_v25 = vadd.f32 %v2579_v21, %v322_v23  ;;  %v321_v26 = vadd.f32 %v312_v24, %v221_v22  ;;  %v2638_v23 = vld [vmem:[%s2889_s5 + $0x20] sm:$0xff] }
  0xe8   :  { %v1799_v32 = vpop.f32.mrf.mxu1 }
  0xe9   :  { %v333_v27 = vmax.f32 %v331_v25, 0.0  ;;  %v330_v28 = vadd.f32 %v2579_v21, %v321_v26  ;;  %v2646_v25 = vld [vmem:[%s2888_s3 + $0x140] sm:$0xff] }
  0xea   :  { %v428_v38 = vpop.f32.mrf.mxu1 }
  0xeb   :  { %335 = vst [vmem:[#allocation3 + $0x9] sm:$0xff] %v333_v27  ;;  %v332_v29 = vmax.f32 %v330_v28, 0.0 }
  0xed   :  { %334 = vst [vmem:[#allocation3 + $0x1] sm:$0xff] %v332_v29  ;;  %1870 = vmatprep.mubr.f32.mxu0 %v332_v29 }
  0xee   :  { %1871 = vmatmul.mubr.f32.vlgmr.msra.gmra.mxu0 %v333_v27  ;;  %v2652_v27 = vld [vmem:[%s2889_s5 + $0x18] sm:$0xff] }
  0xef   :  { %1909 = vmatpush3.msra.mxu0 %v2543_v6 }
  0xf0   :  { %1910 = vmatprep.subr.mxu0 %v2586_v30 }
  0xf1   :  { %1911 = vmatpush3.msra.mxu0 %v2586_v30 }
  0xf2   :  { %1912 = vmatprep.subr.mxu0 %v2592_v31 }
  0xf3   :  { %1913 = vmatpush3.msra.mxu0 %v2592_v31 }
  0xf4   :  { %v624_v35 = vld [vmem:[#allocation3] sm:$0xff]  ;;  %v625_v36 = vld [vmem:[#allocation3 + $0x8] sm:$0xff]  ;;  %1914 = vmatprep.subr.mxu0 %v2599_v33 }
  0xf5   :  { %v811_v37 = vld [vmem:[#allocation3 + $0x2] sm:$0xff]  ;;  %1905 = vmatprep.mubr.f32.mxu1 %v624_v35  ;;  %1915 = vmatpush3.msra.mxu0 %v2599_v33 }
  0xf6   :  { %1940 = vmatprep.mubr.f32.mxu0 %v811_v37  ;;  %v1818_v40 = vpop.f32.mrf.mxu0  ;;  %1906 = vmatmul.mubr.f32.vlgmr.msra.gmra.mxu1 %v625_v36  ;;  %v2671_v36 = vld [vmem:[%s2888_s3 + $0x138] sm:$0xff] }
  0xf7   :  { %v515_v14 = vadd.f32 %v1818_v40, %v1799_v32  ;;  %1944 = vmatpush3.msra.mxu1 %v2573_v12  ;;  %1916 = vmatprep.subr.mxu0 %v2606_v34  ;;  %v2664_v32 = vld [vmem:[%s2889_s5 + $0x10] sm:$0xff] }
  0xf8   :  { %v509_v18 = vpop.f32.mrf.mxu0  ;;  %1945 = vmatprep.subr.mxu1 %v2612_v39  ;;  %1917 = vmatpush3.msra.mxu0 %v2606_v34  ;;  %v1837_v22 = vpop.f32.mrf.mxu1 }
  0xf9   :  { %v510_v20 = vadd.f32 %v509_v18, %v428_v38  ;;  %1946 = vmatpush3.msra.mxu1 %v2612_v39  ;;  %1918 = vmatprep.subr.mxu0 %v2618_v13  ;;  %v610_v24 = vadd.f32 %v1837_v22, %v515_v14  ;;  %v2680_v38 = vld [vmem:[%s2889_s5 + $0x8] sm:$0xff]  ;;  %v2697_v14 = vld [vmem:[%s2889_s5] sm:$0xff]  ;;  %v2733_v22 = vld [vmem:[%s2888_s3 + $0x110] sm:$0xff] }
  0xfa   :  { %1947 = vmatprep.subr.mxu1 %v2624_v17  ;;  %1919 = vmatpush3.msra.mxu0 %v2618_v13  ;;  %v600_v26 = vpop.f32.mrf.mxu1  ;;  %v2714_v18 = vld [vmem:[%s2888_s3 + $0x120] sm:$0xff] }
  0xfb   :  { %1948 = vmatpush3.msra.mxu1 %v2624_v17  ;;  %1920 = vmatprep.subr.mxu0 %v2632_v19  ;;  %v2656_v28 = vadd.f32 %v2579_v21, %v610_v24  ;;  %v609_v29 = vadd.f32 %v600_v26, %v510_v20  ;;  %v2724_v20 = vld [vmem:[%s2888_s3 + $0x118] sm:$0xff] }
  0xfc   :  { %1949 = vmatprep.subr.mxu1 %v2638_v23  ;;  %1921 = vmatpush3.msra.mxu0 %v2632_v19 }
  0xfd   :  { %1950 = vmatpush3.msra.mxu1 %v2638_v23  ;;  %1922 = vmatprep.subr.mxu0 %v2646_v25  ;;  %v621_v35 = vmax.f32 %v2656_v28, 0.0  ;;  %v618_v37 = vadd.f32 %v2579_v21, %v609_v29  ;;  %v2689_v21 = vld [vmem:[%s2888_s3 + $0x130] sm:$0xff] }
  0xfe   :  { %1951 = vmatprep.subr.mxu1 %v2652_v27  ;;  %1923 = vmatpush3.msra.mxu0 %v2646_v25 }
  0xff   :  { %1952 = vmatpush3.msra.mxu1 %v2652_v27  ;;  %1959 = vmatprep.mubr.msk.f32.mxu1 %vm26_vm0, %v2185_v9  ;;  %623 = vst [vmem:[#allocation3 + $0x1b] sm:$0xff] %v621_v35  ;;  %v620_v40 = vmax.f32 %v618_v37, 0.0  ;;  %v2703_v9 = vld [vmem:[%s2888_s3 + $0x128] sm:$0xff] }
 0x100   :  { %1953 = vmatprep.subr.mxu1 %v2664_v32  ;;  %1924 = vmatprep.subr.mxu0 %v2671_v36 }
 0x101   :  { %1954 = vmatpush3.msra.mxu1 %v2664_v32  ;;  %1925 = vmatpush3.msra.mxu0 %v2671_v36  ;;  %622 = vst [vmem:[#allocation3 + $0x13] sm:$0xff] %v620_v40 }
 0x102   :  { %1955 = vmatprep.subr.mxu1 %v2680_v38  ;;  %1926 = vmatprep.subr.mxu0 %v2689_v21 }
 0x103   :  { %1956 = vmatpush3.msra.mxu1 %v2680_v38  ;;  %1927 = vmatpush3.msra.mxu0 %v2689_v21 }
 0x104   :  { %1957 = vmatprep.subr.mxu1 %v2697_v14  ;;  %1928 = vmatprep.subr.mxu0 %v2703_v9 }
 0x105   :  { %1958 = vmatpush3.msra.mxu1 %v2697_v14  ;;  %1929 = vmatpush3.msra.mxu0 %v2703_v9 }
 0x106   :  { %1960 = vmatmul.mubr.msk.f32.vlgmr.msra.gmra.mxu1 %vm26_vm0, %v2190_v10  ;;  %1962 = vmatprep.subr.mxu1 %v2343_v41  ;;  %v2742_v10 = vld [vmem:[%s2888_s3 + $0x108] sm:$0xff] }
 0x107   :  { %1963 = vmatpush3.msra.mxu1 %v2343_v41  ;;  %1930 = vmatprep.subr.mxu0 %v2714_v18  ;;  %v2751_v41 = vld [vmem:[%s2888_s3 + $0x100] sm:$0xff] }
 0x108   :  { %1964 = vmatprep.subr.mxu1 %v2350_v42  ;;  %1931 = vmatpush3.msra.mxu0 %v2714_v18 }
 0x109   :  { %1965 = vmatpush3.msra.mxu1 %v2350_v42  ;;  %1932 = vmatprep.subr.mxu0 %v2724_v20  ;;  %v812_v42 = vld [vmem:[#allocation3 + $0xa] sm:$0xff] }
 0x10a   :  { %1966 = vmatprep.subr.mxu1 %v2357_v43  ;;  %1933 = vmatpush3.msra.mxu0 %v2724_v20 }
 0x10b   :  { %1967 = vmatpush3.msra.mxu1 %v2357_v43  ;;  %1934 = vmatprep.subr.mxu0 %v2733_v22  ;;  %v1020_v43 = vld [vmem:[#allocation3 + $0x12] sm:$0xff] }
 0x10c   :  { %1968 = vmatprep.subr.mxu1 %v2364_v44  ;;  %1935 = vmatpush3.msra.mxu0 %v2733_v22 }
 0x10d   :  { %1969 = vmatpush3.msra.mxu1 %v2364_v44  ;;  %1936 = vmatprep.subr.mxu0 %v2742_v10  ;;  %v1206_v44 = vld [vmem:[#allocation3 + $0x14] sm:$0xff] }
 0x10e   :  { %1970 = vmatprep.subr.mxu1 %v2376_v46  ;;  %1937 = vmatpush3.msra.mxu0 %v2742_v10 }
 0x10f   :  { %1971 = vmatpush3.msra.mxu1 %v2376_v46  ;;  %1938 = vmatprep.subr.mxu0 %v2751_v41  ;;  %v1207_v46 = vld [vmem:[#allocation3 + $0x1c] sm:$0xff] }
 0x110   :  { %1972 = vmatprep.subr.mxu1 %v2396_v49  ;;  %1939 = vmatpush3.msra.mxu0 %v2751_v41 }
 0x111   :  { %1973 = vmatpush3.msra.mxu1 %v2396_v49  ;;  %1941 = vmatmul.mubr.f32.vlgmr.msra.gmra.mxu0 %v812_v42 }
 0x112   :  { %1974 = vmatprep.subr.mxu1 %v2408_v51  ;;  %1997 = vmatprep.subr.mxu0 %v2370_v45 }
 0x113   :  { %1975 = vmatpush3.msra.mxu1 %v2408_v51  ;;  %1994 = vmatprep.mubr.f32.mxu1 %v620_v40 }
 0x114   :  { %1976 = vmatprep.subr.mxu1 %v2415_v52  ;;  %1998 = vmatpush3.msra.mxu0 %v2370_v45  ;;  %v1021_v45 = vld [vmem:[#allocation3 + $0x1a] sm:$0xff] }
 0x115   :  { %1977 = vmatpush3.msra.mxu1 %v2415_v52  ;;  %2029 = vmatprep.mubr.f32.mxu0 %v1020_v43 }
 0x116   :  { %1978 = vmatprep.subr.mxu1 %v2436_v55  ;;  %1999 = vmatprep.subr.mxu0 %v2384_v47 }
 0x117   :  { %1979 = vmatpush3.msra.mxu1 %v2436_v55  ;;  %2000 = vmatpush3.msra.mxu0 %v2384_v47 }
 0x118   :  { %1980 = vmatprep.subr.mxu1 %v2450_v57  ;;  %2001 = vmatprep.subr.mxu0 %v2389_v48 }
 0x119   :  { %1981 = vmatpush3.msra.mxu1 %v2450_v57  ;;  %2002 = vmatpush3.msra.mxu0 %v2389_v48 }
 0x11a   :  { %1982 = vmatprep.subr.mxu1 %v2464_v59  ;;  %2003 = vmatprep.subr.mxu0 %v2402_v50 }
 0x11b   :  { %1983 = vmatpush3.msra.mxu1 %v2464_v59  ;;  %2004 = vmatpush3.msra.mxu0 %v2402_v50 }
 0x11c   :  { %1984 = vmatprep.subr.mxu1 %v2473_v60  ;;  %2005 = vmatprep.subr.mxu0 %v2421_v53 }
 0x11d   :  { %1985 = vmatpush3.msra.mxu1 %v2473_v60  ;;  %2006 = vmatpush3.msra.mxu0 %v2421_v53 }
 0x11e   :  { %1986 = vmatprep.subr.mxu1 %v2487_v62  ;;  %2007 = vmatprep.subr.mxu0 %v2430_v54 }
 0x11f   :  { %1987 = vmatpush3.msra.mxu1 %v2487_v62  ;;  %2008 = vmatpush3.msra.mxu0 %v2430_v54  ;;  %v1496_v54 = vld [vmem:[%s2891_s4] ss:$0 sm:$0xff] }
 0x120   :  { %1988 = vmatprep.subr.mxu1 %v2501_v0  ;;  %2009 = vmatprep.subr.mxu0 %v2444_v56 }
 0x121   :  { %1989 = vmatpush3.msra.mxu1 %v2501_v0  ;;  %2010 = vmatpush3.msra.mxu0 %v2444_v56 }
 0x122   :  { %1990 = vmatprep.subr.mxu1 %v2515_v2  ;;  %2011 = vmatprep.subr.mxu0 %v2458_v58 }
 0x123   :  { %1991 = vmatpush3.msra.mxu1 %v2515_v2  ;;  %2012 = vmatpush3.msra.mxu0 %v2458_v58 }
 0x124   :  { %1992 = vmatprep.subr.mxu1 %v2529_v4  ;;  %2013 = vmatprep.subr.mxu0 %v2481_v61 }
 0x125   :  { %1993 = vmatpush3.msra.mxu1 %v2529_v4  ;;  %2014 = vmatpush3.msra.mxu0 %v2481_v61 }
 0x126   :  { %1995 = vmatmul.mubr.f32.vlgmr.msra.gmra.mxu1 %v621_v35  ;;  %2032 = vmatprep.subr.mxu1 %v2543_v6 }
 0x127   :  { %2033 = vmatpush3.msra.mxu1 %v2543_v6  ;;  %2064 = vmatprep.mubr.f32.mxu1 %v1206_v44 }
 0x128   :  { %2015 = vmatprep.subr.mxu0 %v2495_v63  ;;  %2034 = vmatprep.subr.mxu1 %v2586_v30 }
 0x129   :  { %2016 = vmatpush3.msra.mxu0 %v2495_v63  ;;  %2035 = vmatpush3.msra.mxu1 %v2586_v30 }
 0x12a   :  { %2017 = vmatprep.subr.mxu0 %v2509_v1  ;;  %2036 = vmatprep.subr.mxu1 %v2592_v31 }
 0x12b   :  { %2018 = vmatpush3.msra.mxu0 %v2509_v1  ;;  %2037 = vmatpush3.msra.mxu1 %v2592_v31 }
 0x12c   :  { %2019 = vmatprep.subr.mxu0 %v2523_v3  ;;  %2038 = vmatprep.subr.mxu1 %v2599_v33 }
 0x12d   :  { %2020 = vmatpush3.msra.mxu0 %v2523_v3  ;;  %2039 = vmatpush3.msra.mxu1 %v2599_v33 }
 0x12e   :  { %2021 = vmatprep.subr.mxu0 %v2537_v5  ;;  %2040 = vmatprep.subr.mxu1 %v2606_v34 }
 0x12f   :  { %2022 = vmatpush3.msra.mxu0 %v2537_v5  ;;  %2041 = vmatpush3.msra.mxu1 %v2606_v34 }
 0x130   :  { %2023 = vmatprep.subr.mxu0 %v2549_v7  ;;  %2042 = vmatprep.subr.mxu1 %v2618_v13 }
 0x131   :  { %2024 = vmatpush3.msra.mxu0 %v2549_v7  ;;  %2043 = vmatpush3.msra.mxu1 %v2618_v13 }
 0x132   :  { %2025 = vmatprep.subr.mxu0 %v2556_v8  ;;  %2044 = vmatprep.subr.mxu1 %v2632_v19 }
 0x133   :  { %2026 = vmatpush3.msra.mxu0 %v2556_v8  ;;  %2045 = vmatpush3.msra.mxu1 %v2632_v19 }
 0x134   :  { %2027 = vmatprep.subr.mxu0 %v2564_v11  ;;  %2046 = vmatprep.subr.mxu1 %v2646_v25 }
 0x135   :  { %2028 = vmatpush3.msra.mxu0 %v2564_v11  ;;  %2047 = vmatpush3.msra.mxu1 %v2646_v25 }
 0x136   :  { %2030 = vmatmul.mubr.f32.vlgmr.msra.gmra.mxu0 %v1021_v45  ;;  %2048 = vmatprep.subr.mxu1 %v2671_v36 }
 0x137   :  { %2049 = vmatpush3.msra.mxu1 %v2671_v36  ;;  %2067 = vmatprep.subr.mxu0 %v2573_v12 }
 0x138   :  { %2050 = vmatprep.subr.mxu1 %v2689_v21  ;;  %2068 = vmatpush3.msra.mxu0 %v2573_v12 }
 0x139   :  { %2051 = vmatpush3.msra.mxu1 %v2689_v21  ;;  %2069 = vmatprep.subr.mxu0 %v2612_v39 }
 0x13a   :  { %2052 = vmatprep.subr.mxu1 %v2703_v9  ;;  %2070 = vmatpush3.msra.mxu0 %v2612_v39 }
 0x13b   :  { %2053 = vmatpush3.msra.mxu1 %v2703_v9  ;;  %2071 = vmatprep.subr.mxu0 %v2624_v17 }
 0x13c   :  { %2054 = vmatprep.subr.mxu1 %v2714_v18  ;;  %2072 = vmatpush3.msra.mxu0 %v2624_v17 }
 0x13d   :  { %2055 = vmatpush3.msra.mxu1 %v2714_v18  ;;  %2073 = vmatprep.subr.mxu0 %v2638_v23 }
 0x13e   :  { %2056 = vmatprep.subr.mxu1 %v2724_v20  ;;  %2074 = vmatpush3.msra.mxu0 %v2638_v23 }
 0x13f   :  { %2057 = vmatpush3.msra.mxu1 %v2724_v20  ;;  %2075 = vmatprep.subr.mxu0 %v2652_v27 }
 0x140   :  { %2058 = vmatprep.subr.mxu1 %v2733_v22  ;;  %2076 = vmatpush3.msra.mxu0 %v2652_v27 }
 0x141   :  { %2059 = vmatpush3.msra.mxu1 %v2733_v22  ;;  %2077 = vmatprep.subr.mxu0 %v2664_v32 }
 0x142   :  { %2060 = vmatprep.subr.mxu1 %v2742_v10  ;;  %2078 = vmatpush3.msra.mxu0 %v2664_v32 }
 0x143   :  { %2061 = vmatpush3.msra.mxu1 %v2742_v10  ;;  %2079 = vmatprep.subr.mxu0 %v2680_v38 }
 0x144   :  { %2062 = vmatprep.subr.mxu1 %v2751_v41  ;;  %2080 = vmatpush3.msra.mxu0 %v2680_v38 }
 0x145   :  { %2063 = vmatpush3.msra.mxu1 %v2751_v41  ;;  %2081 = vmatprep.subr.mxu0 %v2697_v14 }
 0x146   :  { %2065 = vmatmul.mubr.f32.vlgmr.msra.gmra.mxu1 %v1207_v46  ;;  %2082 = vmatpush3.msra.mxu0 %v2697_v14 }
 0x147   :  { %2083 = vmatprep.mubr.msk.f32.mxu0 %vm26_vm0, %v2225_v15  ;;  %v1497_v15 = vld [vmem:[%s2892_s6] ss:$0 sm:$0xff] }
 0x148   :  { %2084 = vmatmul.mubr.msk.f32.vlgmr.msra.gmra.mxu0 %vm26_vm0, %v2234_v16 }
 0x1ae   :  { %v1872_v47 = vpop.f32.mrf.mxu0 }
 0x1b0   :  { %v727_v49 = vpop.f32.mrf.mxu0 }
 0x1b6   :  { %v1907_v48 = vpop.f32.mrf.mxu1 }
 0x1b7   :  { %v808_v51 = vadd.f32 %v1907_v48, %v1872_v47 }
 0x1b8   :  { %v802_v50 = vpop.f32.mrf.mxu1 }
 0x1b9   :  { %v803_v55 = vadd.f32 %v802_v50, %v727_v49 }
 0x1c6   :  { %v1961_v52 = vpop.f32.mrf.mxu1 }
 0x1c7   :  { %v1013_v60 = vadd.f32 %v1961_v52, %v1497_v15 }
 0x1c8   :  { %v1007_v59 = vpop.f32.mrf.mxu1 }
 0x1c9   :  { %v1008_v63 = vadd.f32 %v1497_v15, %v1007_v59 }
 0x1d1   :  { %v1942_v53 = vpop.f32.mrf.mxu0 }
 0x1d2   :  { %v906_v56 = vadd.f32 %v1942_v53, %v808_v51 }
 0x1d3   :  { %v896_v57 = vpop.f32.mrf.mxu0 }
 0x1d4   :  { %v915_v58 = vadd.f32 %v1496_v54, %v906_v56  ;;  %v905_v16 = vadd.f32 %v896_v57, %v803_v55 }
 0x1d6   :  { %v917_v61 = vmax.f32 %v915_v58, 0.0  ;;  %v914_v62 = vadd.f32 %v1496_v54, %v905_v16 }
 0x1d8   :  { %v1017_v0 = vadd.f32 %v1013_v60, %v917_v61  ;;  %v916_v1 = vmax.f32 %v914_v62, 0.0 }
 0x1da   :  { %1019 = vst [vmem:[%s2893_s7 + $0x8] sm:$0xff] %v1017_v0  ;;  %v1016_v2 = vadd.f32 %v1008_v63, %v916_v1 }
 0x1dc   :  { %1018 = vst [vmem:[%s2893_s7] sm:$0xff] %v1016_v2 }
 0x1e6   :  { %v1996_v3 = vpop.f32.mrf.mxu1 }
 0x1e8   :  { %v1122_v5 = vpop.f32.mrf.mxu1 }
 0x1f6   :  { %v2031_v4 = vpop.f32.mrf.mxu0 }
 0x1f7   :  { %v1203_v7 = vadd.f32 %v2031_v4, %v1996_v3 }
 0x1f8   :  { %v1197_v6 = vpop.f32.mrf.mxu0 }
 0x1f9   :  { %v1198_v11 = vadd.f32 %v1197_v6, %v1122_v5 }
 0x206   :  { %v2066_v8 = vpop.f32.mrf.mxu1 }
 0x207   :  { %v1300_v12 = vadd.f32 %v2066_v8, %v1203_v7 }
 0x208   :  { %v1290_v30 = vpop.f32.mrf.mxu1  ;;  %v2085_v31 = vpop.f32.mrf.mxu0 }
 0x209   :  { %v1309_v33 = vadd.f32 %v1496_v54, %v1300_v12  ;;  %v1299_v34 = vadd.f32 %v1290_v30, %v1198_v11  ;;  %v1407_v39 = vadd.f32 %v2085_v31, %v1497_v15 }
 0x20a   :  { %v1401_v13 = vpop.f32.mrf.mxu0 }
 0x20b   :  { %v1311_v17 = vmax.f32 %v1309_v33, 0.0  ;;  %v1308_v19 = vadd.f32 %v1496_v54, %v1299_v34  ;;  %v1402_v25 = vadd.f32 %v1497_v15, %v1401_v13 }
 0x20d   :  { %v1310_v23 = vmax.f32 %v1308_v19, 0.0  ;;  %v1411_v24 = vadd.f32 %v1407_v39, %v1311_v17 }
 0x20f   :  { %1413 = vst [vmem:[%s2893_s7 + $0x18] sm:$0xff] %v1411_v24  ;;  %v1410_v26 = vadd.f32 %v1402_v25, %v1310_v23 }
 0x211   :  { %1412 = vst [vmem:[%s2893_s7 + $0x10] sm:$0xff] %v1410_v26 }

</bundles_post_ra>
